<compile_context>
chip_gen: v7x
topology: tpu7x:2x2x1
jax: 0.10.0
libtpu: 0.0.40
codegen_flags: <defaults>
</compile_context>

<pallas_src>
import functools
import math

import jax
import jax.numpy as jnp
from jax.experimental import pallas as pl
from jax.experimental.pallas import tpu as pltpu


def _round_up(x, m):
    return (x + m - 1) // m * m


def _cdiv(a, b):
    return (a + b - 1) // b


def _vmem_capacity_bytes():
    try:
        info = pltpu.get_tpu_info()
        cap = getattr(info, "vmem_capacity_bytes", None)
        if cap and int(cap) > 8 * 1024 * 1024:
            return int(cap)
    except Exception:
        pass
    return 64 * 1024 * 1024  # conservative (v7x per-core VMEM)


def _num_tensorcores():
    try:
        info = pltpu.get_tpu_info()
        for name in ("num_cores", "core_count", "num_tensorcores"):
            v = getattr(info, name, None)
            if v:
                return int(v)
    except Exception:
        pass
    return 1


def _vmem_need(tm, tk, d, n_pad, x_bytes, w_bytes, out_bytes, sep_acc):
    need = 2 * tm * d * x_bytes            # x row tile (double-buffered, orig dtype)
    need += 2 * d * tk * w_bytes           # W1 chunk (double-buffered)
    need += 2 * tk * n_pad * w_bytes       # W2 chunk (double-buffered)
    need += 2 * tm * n_pad * out_bytes     # output tile (double-buffered)
    need += 2 * (tk + n_pad) * 4           # biases
    if sep_acc:
        need += tm * n_pad * 4             # f32 accumulator scratch
    return need


def _ff_kernel(x_ref, w1_ref, b1_ref, w2_ref, b2_ref, o_ref, *scratch,
               acc_in_out, approx_gelu):
    # x_ref:  (TM, D)        input row tile, original dtype (resident across k)
    # w1_ref: (D, TK)        bf16 W1 chunk (contiguous slab, leading k dim squeezed)
    # b1_ref: (1, TK)        f32 b1 chunk
    # w2_ref: (TK, N_pad)    bf16 W2 chunk
    # b2_ref: (1, N_pad)     f32 b2
    # o_ref:  (TM, N_pad)    output tile (VMEM-resident across the k reduction)
    k = pl.program_id(1)
    acc_ref = o_ref if acc_in_out else scratch[0]

    @pl.when(k == 0)
    def _init():
        if acc_in_out:
            # f32 output block doubles as the accumulator; seed it with the bias.
            acc_ref[...] = jnp.broadcast_to(b2_ref[...], acc_ref.shape)
        else:
            acc_ref[...] = jnp.zeros_like(acc_ref)

    # ---- Linear 1 on the MXU (bf16 operands, f32 accumulation) + bias in f32 ----
    xb = x_ref[...].astype(w1_ref.dtype)
    h = jnp.dot(xb, w1_ref[...], preferred_element_type=jnp.float32)
    h = h + b1_ref[...]

    # ---- GELU (exact erf by default, matching torch.nn.GELU()) ----
    if approx_gelu:
        h = jax.nn.gelu(h, approximate=True)   # tanh path (EUP) if VALU-bound
    else:
        h = 0.5 * h * (1.0 + jax.lax.erf(h * jnp.float32(1.0 / math.sqrt(2.0))))

    # Dropout(p=0.0) is the identity -> no-op.
    # TODO(synk): training-mode Dropout with p>0 (pltpu.prng_seed/prng_random_bits)
    # is not implemented; this matches eval-mode / dropout=0.0 of the module.

    # ---- Linear 2 chunk on the MXU, accumulated in f32 ----
    acc_ref[...] += jnp.dot(h.astype(w2_ref.dtype), w2_ref[...],
                            preferred_element_type=jnp.float32)

    if not acc_in_out:
        @pl.when(k == pl.num_programs(1) - 1)
        def _finalize():
            o_ref[...] = (acc_ref[...] + b2_ref[...]).astype(o_ref.dtype)


def prepare_params(w1, b1, w2, b2, *, compute_dtype=jnp.bfloat16, tk=None):
    """One-time weight prep (do this OUTSIDE the hot path).

    w1:(dim, inner) b1:(inner,) w2:(inner, dim_out) b2:(dim_out,), i.e. weights are
    stored transposed vs torch.nn.Linear so the kernel computes x @ W + b.
    """
    D, inner = w1.shape
    inner2, dim_out = w2.shape
    assert inner2 == inner and b1.shape == (inner,) and b2.shape == (dim_out,)

    N_pad = _round_up(dim_out, 128)
    if tk is None:
        tk = min(1024, _round_up(inner, 128))
        # keep the double-buffered weight chunks within a modest slice of VMEM
        while tk > 256 and 2 * (D * tk + tk * N_pad) * 2 > 24 * 1024 * 1024:
            tk //= 2
    tk = max(128, _round_up(tk, 128))
    inner_pad = _round_up(inner, tk)
    n_k = inner_pad // tk

    # W1: zero-pad the inner dim, then lay out as (n_k, D, tk) so each streamed
    # k-chunk is one contiguous HBM slab (no strided (D, tk) window DMA).
    w1p = w1 if inner_pad == inner else jnp.pad(w1, ((0, 0), (0, inner_pad - inner)))
    w1p = w1p.astype(compute_dtype).reshape(D, n_k, tk).transpose(1, 0, 2)
    b1p = b1 if inner_pad == inner else jnp.pad(b1, (0, inner_pad - inner))
    b1p = b1p.reshape(1, inner_pad).astype(jnp.float32)
    w2p = w2
    if inner_pad != inner or N_pad != dim_out:
        w2p = jnp.pad(w2, ((0, inner_pad - inner), (0, N_pad - dim_out)))
    w2p = w2p.astype(compute_dtype)
    b2p = b2 if N_pad == dim_out else jnp.pad(b2, (0, N_pad - dim_out))
    b2p = b2p.reshape(1, N_pad).astype(jnp.float32)

    return dict(w1=w1p, b1=b1p, w2=w2p, b2=b2p,
                dim=D, inner=inner, inner_pad=inner_pad, dim_out=dim_out,
                N_pad=N_pad, tk=tk, n_k=n_k)


def feedforward(x, params, *, tm=None, out_dtype=None, approx_gelu=False,
                interpret=False):
    """x: (..., dim) -> (..., dim_out) using prepared params from prepare_params."""
    D = params["dim"]
    dim_out = params["dim_out"]
    N_pad = params["N_pad"]
    tk = params["tk"]
    n_k = params["n_k"]
    inner_pad = params["inner_pad"]
    w_bytes = params["w1"].dtype.itemsize

    orig_shape = x.shape
    assert orig_shape[-1] == D, "last dim of x must equal dim"
    M = math.prod(orig_shape[:-1])
    x2 = x.reshape(M, D)

    out_dtype = x.dtype if out_dtype is None else jnp.dtype(out_dtype)
    acc_in_out = out_dtype == jnp.dtype(jnp.float32)
    x_bytes = x2.dtype.itemsize
    out_bytes = jnp.dtype(out_dtype).itemsize

    # ---- per-generation VMEM budget and tile-size selection ----
    vmem_cap = _vmem_capacity_bytes()
    vmem_limit = max(32 * 1024 * 1024, min(int(vmem_cap * 0.85), 112 * 1024 * 1024))
    budget = vmem_limit - 4 * 1024 * 1024

    if tm is None:
        tm = 1024 if vmem_cap >= 96 * 1024 * 1024 else 512
    tm = min(tm, _round_up(M, 16))

    # Megacore: keep >=2 row tiles when the chip reports >=2 TensorCores.
    n_cores = _num_tensorcores()
    if n_cores >= 2 and M >= 32 * n_cores and _cdiv(M, tm) < n_cores:
        tm = _round_up(_cdiv(M, n_cores), 16)

    while tm > 16 and _vmem_need(tm, tk, D, N_pad, x_bytes, w_bytes, out_bytes,
                                 not acc_in_out) > budget:
        tm = max(16, _round_up(tm // 2, 16))
    # TODO(synk): for very large dim_out on v7x, add a third "parallel" N tile axis
    # instead of shrinking tm (not needed for these shapes).

    m_tiles = _cdiv(M, tm)
    grid = (m_tiles, n_k)

    weight_bytes = (params["w1"].size * params["w1"].dtype.itemsize
                    + params["w2"].size * params["w2"].dtype.itemsize
                    + params["b1"].size * 4 + params["b2"].size * 4)
    cost = pl.CostEstimate(
        flops=2 * M * (D * inner_pad + inner_pad * N_pad),
        transcendentals=M * inner_pad,
        # weights are re-streamed once per row tile
        bytes_accessed=M * D * x_bytes + m_tiles * weight_bytes + M * N_pad * out_bytes,
    )

    kernel = functools.partial(_ff_kernel, acc_in_out=acc_in_out,
                               approx_gelu=approx_gelu)
    scratch_shapes = [] if acc_in_out else [pltpu.VMEM((tm, N_pad), jnp.float32)]

    out = pl.pallas_call(
        kernel,
        out_shape=jax.ShapeDtypeStruct((M, N_pad), out_dtype),
        grid_spec=pltpu.PrefetchScalarGridSpec(
            num_scalar_prefetch=0,
            grid=grid,
            in_specs=[
                pl.BlockSpec((tm, D), lambda i, k: (i, 0)),           # x rows (resident over k)
                pl.BlockSpec((None, D, tk), lambda i, k: (k, 0, 0)),  # W1 chunk (contiguous slab)
                pl.BlockSpec((1, tk), lambda i, k: (0, k)),           # b1 chunk
                pl.BlockSpec((tk, N_pad), lambda i, k: (k, 0)),       # W2 chunk (contiguous slab)
                pl.BlockSpec((1, N_pad), lambda i, k: (0, 0)),        # b2 (tiny, constant)
            ],
            out_specs=pl.BlockSpec((tm, N_pad), lambda i, k: (i, 0)),
            scratch_shapes=scratch_shapes,
        ),
        compiler_params=pltpu.CompilerParams(
            dimension_semantics=("parallel", "arbitrary"),
            vmem_limit_bytes=vmem_limit,
        ),
        cost_estimate=cost,
        interpret=interpret,
    )(x2, params["w1"], params["b1"], params["w2"], params["b2"])

    if N_pad != dim_out:
        out = out[:, :dim_out]
    return out.reshape(*orig_shape[:-1], dim_out)


def init_params(key, dim, dim_out=None, mult=4, dtype=jnp.float32):
    """Deterministic init matching torch Linear shapes (stored transposed)."""
    inner_dim = int(dim * mult)
    dim_out = dim if dim_out is None else dim_out
    k1, k2, k3, k4 = jax.random.split(key, 4)
    bound1 = 1.0 / math.sqrt(dim)
    bound2 = 1.0 / math.sqrt(inner_dim)
    w1 = jax.random.uniform(k1, (dim, inner_dim), dtype, -bound1, bound1)
    b1 = jax.random.uniform(k2, (inner_dim,), dtype, -bound1, bound1)
    w2 = jax.random.uniform(k3, (inner_dim, dim_out), dtype, -bound2, bound2)
    b2 = jax.random.uniform(k4, (dim_out,), dtype, -bound2, bound2)
    return w1, b1, w2, b2


def feedforward_ref(x, w1, b1, w2, b2):
    h = x @ w1 + b1
    h = 0.5 * h * (1.0 + jax.lax.erf(h / jnp.sqrt(2.0).astype(h.dtype)))
    return h @ w2 + b2


if __name__ == "__main__":
    key = jax.random.PRNGKey(0)

    # Test 1: module defaults at a small shape (dim=32, mult=4 -> inner=128).
    kx, kp, key = jax.random.split(key, 3)
    B, S, dim = 2, 8, 32
    x = jax.random.normal(kx, (B, S, dim), dtype=jnp.float32)
    w1, b1, w2, b2 = init_params(kp, dim)
    params = prepare_params(w1, b1, w2, b2)                # one-time weight prep
    out = jax.block_until_ready(feedforward(x, params))
    ref = feedforward_ref(x, w1, b1, w2, b2)
    assert out.shape == (B, S, dim)
    assert jnp.allclose(out, ref, atol=2e-2, rtol=2e-2), "toy-shape mismatch"

    # Test 2: multi-step grid on both axes (M=512 rows, 4 inner-dim chunks).
    kx2, kp2, key = jax.random.split(key, 3)
    B2, S2, dim2 = 2, 256, 256
    x2 = jax.random.normal(kx2, (B2, S2, dim2), dtype=jnp.float32)
    raw2 = init_params(kp2, dim2)
    params2 = prepare_params(*raw2, tk=256)                # force 4 k-chunks
    out2 = jax.block_until_ready(feedforward(x2, params2))
    ref2 = feedforward_ref(x2, *raw2)
    assert out2.shape == (B2, S2, dim2)
    assert jnp.allclose(out2, ref2, atol=2e-2, rtol=2e-2), "tiled-shape mismatch"

    # Test 3: bf16 output path (separate f32 scratch accumulator + finalize cast).
    out3 = jax.block_until_ready(feedforward(x, params, out_dtype=jnp.bfloat16))
    assert out3.dtype == jnp.bfloat16
    assert jnp.allclose(out3.astype(jnp.float32), ref, atol=6e-2, rtol=6e-2), \
        "bf16-output mismatch"

    print("KERNEL_OK")
</pallas_src>

<mosaic_0001>
module attributes {stable_mosaic.version = 11 : i64} {
  func.func @_ff_kernel(%arg0: i32, %arg1: i32, %arg2: memref<16x32xf32, #tpu.memory_space<vmem>>, %arg3: memref<1x32x128xbf16, #tpu.memory_space<vmem>>, %arg4: memref<1x128xf32, #tpu.memory_space<vmem>>, %arg5: memref<128x128xbf16, #tpu.memory_space<vmem>>, %arg6: memref<1x128xf32, #tpu.memory_space<vmem>>, %arg7: memref<16x128xf32, #tpu.memory_space<vmem>>) attributes {dimension_semantics = [#tpu.dimension_semantics<parallel>, #tpu.dimension_semantics<arbitrary>], iteration_bounds = array<i64: 1, 1>, scalar_prefetch = 0 : i64, scratch_operands = 0 : i64, tpu.core_type = #tpu.core_type<tc>, window_params = [{transform_indices = @transform_0, window_bounds = array<i64: 16, 32>}, {transform_indices = @transform_1, window_bounds = array<i64: 1, 32, 128>}, {transform_indices = @transform_2, window_bounds = array<i64: 1, 128>}, {transform_indices = @transform_3, window_bounds = array<i64: 128, 128>}, {pipeline_mode = #tpu.pipeline_mode<synchronous>, transform_indices = @transform_4, window_bounds = array<i64: 1, 128>}, {transform_indices = @transform_5, window_bounds = array<i64: 16, 128>}]} {
    %c0_i32 = arith.constant 0 : i32
    %0 = arith.cmpi eq, %arg1, %c0_i32 : i32
    %1 = arith.extui %0 : i1 to i32
    %c0_i32_0 = arith.constant 0 : i32
    %2 = arith.cmpi ne, %1, %c0_i32_0 : i32
    scf.if %2 {
      %c0_17 = arith.constant 0 : index
      %c0_18 = arith.constant 0 : index
      %25 = vector.load %arg6[%c0_17, %c0_18] : memref<1x128xf32, #tpu.memory_space<vmem>>, vector<1x128xf32>
      %26 = vector.shape_cast %25 : vector<1x128xf32> to vector<1x128xf32>
      %27 = vector.broadcast %26 : vector<1x128xf32> to vector<16x128xf32>
      %c0_19 = arith.constant 0 : index
      %c0_20 = arith.constant 0 : index
      %28 = vector.load %arg7[%c0_19, %c0_20] : memref<16x128xf32, #tpu.memory_space<vmem>>, vector<16x128xf32>
      tpu.vector_store %arg7[%c0_19, %c0_20], %27 {strides = array<i32>} : memref<16x128xf32, #tpu.memory_space<vmem>>, vector<16x128xf32>,
    } else {
    }
    %c0 = arith.constant 0 : index
    %c0_1 = arith.constant 0 : index
    %3 = vector.load %arg2[%c0, %c0_1] : memref<16x32xf32, #tpu.memory_space<vmem>>, vector<16x32xf32>
    %4 = arith.truncf %3 : vector<16x32xf32> to vector<16x32xbf16>
    %c0_2 = arith.constant 0 : index
    %c0_3 = arith.constant 0 : index
    %c0_4 = arith.constant 0 : index
    %5 = vector.load %arg3[%c0_2, %c0_3, %c0_4] : memref<1x32x128xbf16, #tpu.memory_space<vmem>>, vector<1x32x128xbf16>
    %6 = vector.shape_cast %5 : vector<1x32x128xbf16> to vector<32x128xbf16>
    %cst = arith.constant dense<0.000000e+00> : vector<16x128xf32>
    %7 = tpu.matmul %4, %6, %cst {dimension_numbers = #tpu.dot_dimension_numbers<[1], [0], [0], [1], [0, 0, 1, 1], [], []>} : vector<16x32xbf16>, vector<32x128xbf16>, vector<16x128xf32> -> vector<16x128xf32>
    %c0_5 = arith.constant 0 : index
    %c0_6 = arith.constant 0 : index
    %8 = vector.load %arg4[%c0_5, %c0_6] : memref<1x128xf32, #tpu.memory_space<vmem>>, vector<1x128xf32>
    %9 = vector.broadcast %8 : vector<1x128xf32> to vector<16x128xf32>
    %10 = arith.addf %7, %9 : vector<16x128xf32>
    %cst_7 = arith.constant 5.000000e-01 : f32
    %11 = vector.broadcast %cst_7 : f32 to vector<16x128xf32>
    %12 = arith.mulf %11, %10 : vector<16x128xf32>
    %cst_8 = arith.constant 0.707106769 : f32
    %13 = vector.broadcast %cst_8 : f32 to vector<16x128xf32>
    %14 = arith.mulf %10, %13 : vector<16x128xf32>
    %15 = math.erf %14 : vector<16x128xf32>
    %cst_9 = arith.constant 1.000000e+00 : f32
    %16 = vector.broadcast %cst_9 : f32 to vector<16x128xf32>
    %17 = arith.addf %16, %15 : vector<16x128xf32>
    %18 = arith.mulf %12, %17 : vector<16x128xf32>
    %c0_10 = arith.constant 0 : index
    %c0_11 = arith.constant 0 : index
    %19 = vector.load %arg7[%c0_10, %c0_11] : memref<16x128xf32, #tpu.memory_space<vmem>>, vector<16x128xf32>
    %20 = arith.truncf %18 : vector<16x128xf32> to vector<16x128xbf16>
    %c0_12 = arith.constant 0 : index
    %c0_13 = arith.constant 0 : index
    %21 = vector.load %arg5[%c0_12, %c0_13] : memref<128x128xbf16, #tpu.memory_space<vmem>>, vector<128x128xbf16>
    %cst_14 = arith.constant dense<0.000000e+00> : vector<16x128xf32>
    %22 = tpu.matmul %20, %21, %cst_14 {dimension_numbers = #tpu.dot_dimension_numbers<[1], [0], [0], [1], [0, 0, 1, 1], [], []>} : vector<16x128xbf16>, vector<128x128xbf16>, vector<16x128xf32> -> vector<16x128xf32>
    %23 = arith.addf %19, %22 : vector<16x128xf32>
    %c0_15 = arith.constant 0 : index
    %c0_16 = arith.constant 0 : index
    %24 = vector.load %arg7[%c0_15, %c0_16] : memref<16x128xf32, #tpu.memory_space<vmem>>, vector<16x128xf32>
    tpu.vector_store %arg7[%c0_15, %c0_16], %23 {strides = array<i32>} : memref<16x128xf32, #tpu.memory_space<vmem>>, vector<16x128xf32>,
    return
  }
  func.func @transform_0(%arg0: i32, %arg1: i32) -> (i32, i32) {
    %c0_i32 = arith.constant 0 : i32
    %c0_i32_0 = arith.constant 0 : i32
    return %arg0, %c0_i32 : i32, i32
  }
  func.func @transform_1(%arg0: i32, %arg1: i32) -> (i32, i32, i32) {
    %c0_i32 = arith.constant 0 : i32
    %c0_i32_0 = arith.constant 0 : i32
    %c0_i32_1 = arith.constant 0 : i32
    return %arg1, %c0_i32, %c0_i32_0 : i32, i32, i32
  }
  func.func @transform_2(%arg0: i32, %arg1: i32) -> (i32, i32) {
    %c0_i32 = arith.constant 0 : i32
    %c0_i32_0 = arith.constant 0 : i32
    return %c0_i32, %arg1 : i32, i32
  }
  func.func @transform_3(%arg0: i32, %arg1: i32) -> (i32, i32) {
    %c0_i32 = arith.constant 0 : i32
    %c0_i32_0 = arith.constant 0 : i32
    return %arg1, %c0_i32 : i32, i32
  }
  func.func @transform_4(%arg0: i32, %arg1: i32) -> (i32, i32) {
    %c0_i32 = arith.constant 0 : i32
    %c0_i32_0 = arith.constant 0 : i32
    %c0_i32_1 = arith.constant 0 : i32
    return %c0_i32, %c0_i32_0 : i32, i32
  }
  func.func @transform_5(%arg0: i32, %arg1: i32) -> (i32, i32) {
    %c0_i32 = arith.constant 0 : i32
    %c0_i32_0 = arith.constant 0 : i32
    return %arg0, %c0_i32 : i32, i32
  }
}

</mosaic_0001>

<bundles_post_ra>
// kernel: tpu_custom_call.1
= control target key start
LH: loop header
LB: loop body
LE: loop exit
PB: predicated region body
PF: predicated region fallthrough
CT: control target
= control target key end

     0   :  { %10 = vsyncpa [#allocation3], 0  ;;  %s564_s0 = inlined_call_operand.hbm [shape: f32[16,32], index: 0, kind: input, shape index: {}]   ;;  %s565_s1 = inlined_call_operand.hbm [shape: bf16[1,32,128], index: 1, kind: input, shape index: {}]   ;;  %s566_s2 = inlined_call_operand.vmem [shape: f32[1,128], index: 2, kind: input, shape index: {}]   ;;  %s567_s3 = inlined_call_operand.hbm [shape: bf16[128,128], index: 3, kind: input, shape index: {}]   ;;  %s568_s4 = inlined_call_operand.vmem [shape: f32[1,128], index: 4, kind: input, shape index: {}]   ;;  %s569_s5 = inlined_call_operand.hbm [shape: f32[16,128], index: 5, kind: output, shape index: {}]  }
   0x1   :  { %11 = vsyncpa [#allocation6], 0 }
   0x2   :  { %12 = vsyncpa [#allocation4], 0  ;;  %s458_s18 = smov [#allocation5]   ;;  %s364_s22 = scalar_lea.hbm %s565_s1, 256 }
   0x3   :  { %s30_s19 = sshll.u32 %s458_s18, 4  ;;  %p365_p0 = scmp.ne.s32.totalorder %s565_s1, %s364_s22  ;;  %s31_s19 = int_to_ptr.vmem [resolvable:$true] %s30_s19 }
   0x4   :  { %p368_p1 = scmp.lt.u32.totalorder %s364_s22, %s565_s1 }
   0x6   :  { %p370_p2 = pnand %p368_p1, %p365_p0 }
   0x8   :  { %373 = shalt.err (!%p370_p2)
}
   0x9   :  { %s374_s27 = scalar_lea.vmem %s31_s19, 256  ;;  %p379_p4 = scmp.lt.s32.totalorder %s31_s19, %s31_s19 }
   0xa   :  { %p375_p3 = scmp.ne.s32.totalorder %s31_s19, %s374_s27  ;;  %p380_p5 = scmp.lt.s32.totalorder %s374_s27, %s374_s27 }
   0xc   :  { %p381_p6 = por %p380_p5, %p379_p4 }
   0xe   :  { %p382_p7 = pnand %p381_p6, %p375_p3 }
  0x10   :  { %385 = shalt.err (!%p382_p7)
}
  0x11   :  { %s459_s28 = smov 64   ;;  %s460_s29 = smov 4  }
  0x12   :  { %36 = dma.hbm_to_vmem [thread:$0]  %s565_s1, 256, %s31_s19, [#allocation6], %s459_s28, %s459_s28, %s460_s29  }
  0x13   :  { %s461_s7 = smov [#allocation2]   ;;  %s386_s11 = scalar_lea.hbm %s564_s0, 256 }
  0x14   :  { %s18_s8 = sshll.u32 %s461_s7, 4  ;;  %p387_p8 = scmp.ne.s32.totalorder %s564_s0, %s386_s11  ;;  %s19_s8 = int_to_ptr.vmem [resolvable:$true] %s18_s8 }
  0x15   :  { %p390_p9 = scmp.lt.u32.totalorder %s386_s11, %s564_s0 }
  0x17   :  { %p392_p10 = pnand %p390_p9, %p387_p8 }
  0x19   :  { %395 = shalt.err (!%p392_p10)
}
  0x1a   :  { %s396_s16 = scalar_lea.vmem %s19_s8, 256  ;;  %p401_p12 = scmp.lt.s32.totalorder %s19_s8, %s19_s8 }
  0x1b   :  { %p397_p11 = scmp.ne.s32.totalorder %s19_s8, %s396_s16  ;;  %p402_p13 = scmp.lt.s32.totalorder %s396_s16, %s396_s16 }
  0x1d   :  { %p403_p0 = por %p402_p13, %p401_p12 }
  0x1f   :  { %p404_p1 = pnand %p403_p0, %p397_p11 }
  0x21   :  { %407 = shalt.err (!%p404_p1)
}
  0x22   :  { %s462_s1 = smov 128   ;;  %s463_s17 = smov 8  }
  0x23   :  { %24 = dma.hbm_to_vmem [thread:$0]  %s564_s0, 256, %s19_s8, [#allocation3], %s462_s1, %s462_s1, %s463_s17  }
  0x24   :  { %s464_s20 = smov [#allocation7]   ;;  %s408_s24 = scalar_lea.hbm %s567_s3, 1024 }
  0x25   :  { %s44_s21 = sshll.u32 %s464_s20, 4  ;;  %p409_p2 = scmp.ne.s32.totalorder %s567_s3, %s408_s24  ;;  %s45_s21 = int_to_ptr.vmem [resolvable:$true] %s44_s21 }
  0x26   :  { %p412_p3 = scmp.lt.u32.totalorder %s408_s24, %s567_s3 }
  0x28   :  { %p414_p4 = pnand %p412_p3, %p409_p2 }
  0x2a   :  { %417 = shalt.err (!%p414_p4)
}
  0x2b   :  { %s418_s6 = scalar_lea.vmem %s45_s21, 1024  ;;  %p423_p6 = scmp.lt.s32.totalorder %s45_s21, %s45_s21 }
  0x2c   :  { %p419_p5 = scmp.ne.s32.totalorder %s45_s21, %s418_s6  ;;  %p424_p7 = scmp.lt.s32.totalorder %s418_s6, %s418_s6 }
  0x2e   :  { %p425_p8 = por %p424_p7, %p423_p6 }
  0x30   :  { %p426_p9 = pnand %p425_p8, %p419_p5 }
  0x32   :  { %429 = shalt.err (!%p426_p9)
}
  0x33   :  { %50 = dma.hbm_to_vmem [thread:$0]  %s567_s3, 1024, %s45_s21, [#allocation6], %s459_s28, %s459_s28, %s460_s29  }
  0x34   :  { %452 = dma.done.wait [#allocation3], 256  }
  0x35   :  { %453 = vsyncadd [#allocation3], 4294967040 }
  0x36   :  { %454 = dma.done.wait [#allocation6], 1280  }
  0x37   :  { %455 = vsyncadd [#allocation6], 4294966016  ;;  %v465_v0 = vmov 0.0   ;;  %vm466_vm0 = vmmov 0   ;;  %v350_v1 = vld [vmem:[#allocation5] sm:$0xff]   ;;  %v351_v2 = vld [vmem:[#allocation5 + $0x8] sm:$0xff]  }
  0x38   :  { %312 = vmatprep.subr.bf16.mxu0 %v465_v0  ;;  %316 = vmatprep.mubr.msk.bf16.mxu0 %vm466_vm0, %v465_v0  ;;  %v76_v3 = vld [vmem:[#allocation2] sm:$0xff]  ;;  %v77_v4 = vld [vmem:[#allocation2 + $0x8] sm:$0xff]  ;;  %vm102_vm1 = vcmask 261120   ;;  %v354_v8 = vld [vmem:[#allocation7 + $0x10] sm:$0xff]   ;;  %s467_s8 = smov [#allocation8]  }
  0x39   :  { %320 = vmatprep.subr.bf16.mxu1 %v465_v0  ;;  %336 = vmatprep.mubr.msk.bf16.mxu1 %vm466_vm0, %v465_v0  ;;  %v352_v5 = vld [vmem:[#allocation7] sm:$0xff]   ;;  %v353_v6 = vld [vmem:[#allocation7 + $0x8] sm:$0xff]   ;;  %v78_v7 = vpack.c.bf16 %v77_v4, %v76_v3  ;;  %v355_v9 = vld [vmem:[#allocation7 + $0x18] sm:$0xff]   ;;  %s274_s9 = sshll.u32 %s467_s8, 4  ;;  %s275_s9 = int_to_ptr.vmem [resolvable:$true] %s274_s9 }
  0x3a   :  { %313 = vmatpush3.bf16.msra.mxu0 %v350_v1  ;;  %321 = vmatpush3.bf16.msra.mxu1 %v352_v5  ;;  %v356_v10 = vld [vmem:[#allocation7 + $0x20] sm:$0xff]   ;;  %v357_v11 = vld [vmem:[#allocation7 + $0x28] sm:$0xff]   ;;  %v358_v12 = vld [vmem:[#allocation7 + $0x30] sm:$0xff]   ;;  %s430_s10 = scalar_lea.vmem %s275_s9, 256  ;;  %p435_p11 = scmp.lt.s32.totalorder %s275_s9, %s275_s9 }
  0x3b   :  { %314 = vmatprep.subr.bf16.mxu0 %v465_v0  ;;  %322 = vmatprep.subr.bf16.mxu1 %v465_v0  ;;  %v359_v13 = vld [vmem:[#allocation7 + $0x38] sm:$0xff]   ;;  %v288_v14 = vld [vmem:[%s566_s2] ss:$0 sm:$0xff]  ;;  %p431_p10 = scmp.ne.s32.totalorder %s275_s9, %s430_s10  ;;  %p436_p12 = scmp.lt.s32.totalorder %s430_s10, %s430_s10 }
  0x3c   :  { %v287_v32 = vld [vmem:[%s568_s4] ss:$0 sm:$0xff] }
  0x3d   :  { %p437_p13 = por %p436_p12, %p435_p11 }
  0x3e   :  { %315 = vmatpush3.bf16.msra.mxu0 %v351_v2  ;;  %323 = vmatpush3.bf16.msra.mxu1 %v353_v6 }
  0x3f   :  { %324 = vmatprep.subr.bf16.mxu1 %v465_v0  ;;  %p438_p0 = pnand %p437_p13, %p431_p10 }
  0x41   :  { %317 = vmatmul.mubr.msk.bf16.vlgmr.msra.gmra.mrb[0].mxu0 %vm102_vm1, %v78_v7 }
  0x42   :  { %325 = vmatpush3.bf16.msra.mxu1 %v354_v8 }
  0x43   :  { %326 = vmatprep.subr.bf16.mxu1 %v465_v0 }
  0x46   :  { %327 = vmatpush3.bf16.msra.mxu1 %v355_v9 }
  0x47   :  { %328 = vmatprep.subr.bf16.mxu1 %v465_v0 }
  0x4a   :  { %329 = vmatpush3.bf16.msra.mxu1 %v356_v10 }
  0x4b   :  { %330 = vmatprep.subr.bf16.mxu1 %v465_v0 }
  0x4e   :  { %331 = vmatpush3.bf16.msra.mxu1 %v357_v11 }
  0x4f   :  { %332 = vmatprep.subr.bf16.mxu1 %v465_v0 }
  0x52   :  { %333 = vmatpush3.bf16.msra.mxu1 %v358_v12 }
  0x53   :  { %334 = vmatprep.subr.bf16.mxu1 %v465_v0 }
  0x56   :  { %335 = vmatpush3.bf16.msra.mxu1 %v359_v13 }
 0x114   :  { %v140_v15 = vpop.f32.mrb[0].mxu0 }
 0x115   :  { %v141_v16 = vadd.f32 %v288_v14, %v140_v15  ;;  %v318_v17 = vpop.f32.mrb[1].mxu0 }
 0x116   :  { %v143_v18 = vpop.f32.mrb[2].mxu0 }
 0x117   :  { %v149_v19 = vmul.f32 0.70710677, %v141_v16  ;;  %v144_v20 = vadd.f32 %v288_v14, %v143_v18  ;;  %v319_v21 = vpop.f32.mrb[3].mxu0  ;;  %v147_v26 = vmul.f32 0.5, %v141_v16 }
 0x119   :  { %360 = verf.f32 %v149_v19  ;;  %v150_v22 = vmul.f32 0.70710677, %v144_v20  ;;  %v148_v27 = vmul.f32 0.5, %v144_v20 }
 0x11b   :  { %362 = verf.f32 %v150_v22 }
 0x123   :  { %v361_v23 = vpop.eup %360 }
 0x124   :  { %v153_v24 = vadd.f32 1.0, %v361_v23 }
 0x125   :  { %v363_v25 = vpop.eup %362 }
 0x126   :  { %v154_v28 = vadd.f32 1.0, %v363_v25  ;;  %v155_v29 = vmul.f32 %v153_v24, %v147_v26 }
 0x128   :  { %v156_v30 = vmul.f32 %v154_v28, %v148_v27 }
 0x12a   :  { %v159_v31 = vpack.c.bf16 %v156_v30, %v155_v29 }
 0x12c   :  { %337 = vmatmul.mubr.bf16.vlgmr.msra.gmra.mrb[0].mxu1 %v159_v31 }
 0x1ff   :  { %v258_v33 = vpop.f32.mrb[0].mxu1 }
 0x200   :  { %v265_v34 = vadd.f32 %v287_v32, %v258_v33  ;;  %v338_v35 = vpop.f32.mrb[1].mxu1 }
 0x201   :  { %v261_v36 = vpop.f32.mrb[2].mxu1 }
 0x202   :  { %267 = vst [vmem:[#allocation8] sm:$0xff] %v265_v34  ;;  %v266_v37 = vadd.f32 %v287_v32, %v261_v36  ;;  %v339_v38 = vpop.f32.mrb[3].mxu1 }
 0x204   :  { %268 = vst [vmem:[#allocation8 + $0x8] sm:$0xff] %v266_v37 }
 0x205   :  { %441 = shalt.err (!%p438_p0)
}
 0x206   :  { %s442_s12 = scalar_lea.hbm %s569_s5, 256 }
 0x207   :  { %p443_p1 = scmp.ne.s32.totalorder %s569_s5, %s442_s12  ;;  %p446_p2 = scmp.lt.u32.totalorder %s442_s12, %s569_s5 }
 0x209   :  { %p448_p3 = pnand %p446_p2, %p443_p1 }
 0x20b   :  { %451 = shalt.err (!%p448_p3)
}
 0x20c   :  { %280 = dma.vmem_to_hbm [thread:$0]  %s275_s9, 256, %s569_s5, [#allocation4], %s462_s1, %s462_s1, %s463_s17  }
 0x20d   :  { %456 = dma.done.wait [#allocation4], 256  }
 0x20e   :  { %457 = vsyncadd [#allocation4], 4294967040 }
 0x20f   :  { %284 = vsyncpa [#allocation3], 1 }
 0x210   :  { %285 = vsyncpa [#allocation6], 1 }
 0x211   :  { %286 = vsyncpa [#allocation4], 1 }

</bundles_post_ra>
